<compile_context>
chip_gen: v6e
topology: v6e:2x2x1
jax: 0.10.0
libtpu: 0.0.40
codegen_flags: <defaults>
</compile_context>

<pallas_src>
import functools
import math

import jax
import jax.numpy as jnp
from jax.experimental import pallas as pl
from jax.experimental.pallas import tpu as pltpu


def _round_up(a, b):
    return (a + b - 1) // b * b


def _tpu_generation():
    """Best-effort TPU generation (5/6/7). Defaults to 7 (smallest VMEM) when unknown."""
    try:
        kind = jax.devices()[0].device_kind.lower()
    except Exception:
        return 7
    for g in (7, 6, 5, 4):
        if ("v%d" % g) in kind or ("%dx" % g) in kind:
            return g
    return 7


def _choose_tile_m(m, width, per_row_bytes, resident_bytes, vmem_budget, target):
    """Tile size for the flattened (B*W) row axis.

    Must be a multiple of lcm(width, 8) so that (a) sublane alignment holds and
    (b) every tile starts at a w == 0 row, making the in-kernel roll's circular
    wrap land only on rows that are zero-masked anyway.  Prefer >= 2 tiles
    (parallel grid axis -> both TensorCores on v7x) and as many rows as the
    per-generation VMEM budget allows (mem-bound: bigger tiles -> HBM roofline).
    """
    base = (width * 8) // math.gcd(width, 8)          # lcm(width, 8)
    avail = max(vmem_budget - resident_bytes, per_row_bytes)
    max_rows = max(base, avail // per_row_bytes)
    # TODO(synk): if lcm(width, 8) rows alone exceed the VMEM budget (very large W),
    # tiling inside a width run needs a 1-row halo / program_id-gated wrap mask
    # (or the NCW-native kernel variant); not implemented here.
    cap = min(target, max_rows, _round_up(m, base))
    if m >= 2 * base:
        cap = min(cap, max(base, m // 2))
    cap = max(cap, base)
    return max(base, (cap // base) * base)


def _fused_conv1x1_shift_kernel(x_ref, w_ref, b_ref, mask_ref, o_ref, *, half):
    """One M-tile of: y = x @ W_blockdiag + b, with the pair-element-two half of
    the lanes shifted +1 along the width axis (zero at w == 0).

    x_ref    : (tile_m, Kp)    bf16  rows = (b, w) flattened (w fastest); tile_m % W == 0
    w_ref    : (Kp, N_pad)     bf16  fused block-diagonal grouped-conv1x1 weight,
                                     lanes = [pair-one slab (half) | pair-two slab (half)]
    b_ref    : (1, N_pad)      f32   bias (resident)
    mask_ref : (tile_m, 1)     f32   1.0 where w != 0, 0.0 where w == 0 (resident)
    o_ref    : (tile_m, N_pad) out_dtype
    """
    y = jnp.dot(x_ref[...], w_ref[...], preferred_element_type=jnp.float32)
    y = y + b_ref[...]                                   # f32 bias add (VPU)

    # First slab (pair element one): store as-is; lane-dense unmasked vst.
    o_ref[:, :half] = y[:, :half].astype(o_ref.dtype)

    # Second slab (pair element two): row (b, w) takes row (b, w-1); w == 0 -> 0.
    # The tile starts at a w == 0 row, so the roll's circular wrap only lands on
    # rows where mask == 0.  XLU sublane roll + VPU multiply (free slots vs MXU).
    second = pltpu.roll(y[:, half:], shift=1, axis=0) * mask_ref[...]
    o_ref[:, half:] = second.astype(o_ref.dtype)


@functools.partial(jax.jit, static_argnums=(3, 4))
def parallel_multiple_state_weightings_forward(previous_state_columns,
                                               conv_weight, conv_bias,
                                               paired_weightings_per_group,
                                               out_dtype=None):
    """Forward pass.

    previous_state_columns: list of (B, H, W) NCW arrays (one per previous state).
    conv_weight: (2*H*P, H, 1) weight of nn.Conv1d(H*P, 2*H*P, k=1, groups=P).
    conv_bias:   (2*H*P,)
    Returns list of P pairs (pair_element_one, pair_element_two_shifted), each (B, H, W).
    """
    B, H, W = previous_state_columns[0].shape
    n_cols = len(previous_state_columns)
    P = int(sum(paired_weightings_per_group))
    K = H * n_cols
    HP = H * P
    half = _round_up(HP, 128)                 # each pair-element slab, lane-dense
    N_pad = 2 * half
    if out_dtype is None:
        out_dtype = previous_state_columns[0].dtype
    out_dtype = jnp.dtype(out_dtype)

    gen = _tpu_generation()
    Kp = _round_up(K, 128) if gen <= 5 else K  # lane-dense x rows / full MXU fill on v5e

    # --- channels-last stacked distinct columns (channel repeat NOT materialized) ---
    x = jnp.concatenate([c.transpose(0, 2, 1) for c in previous_state_columns],
                        axis=-1)                               # (B, W, K)
    x = x.reshape(B * W, K).astype(jnp.bfloat16)

    # --- fold "repeat + grouped 1x1 conv" into ONE block-diagonal matmul weight,
    #     with output lanes reordered to [all pair-element-one | all pair-element-two]. ---
    w2d = conv_weight[:, :, 0]                                 # (2*H*P, H)
    wbd = jnp.zeros((Kp, N_pad), jnp.float32)
    bias = jnp.zeros((1, N_pad), jnp.float32)
    g = 0
    for c, reps in enumerate(paired_weightings_per_group):
        for _ in range(int(reps)):
            w_one = w2d[g * 2 * H:g * 2 * H + H, :]            # (H, H) pair element one
            w_two = w2d[g * 2 * H + H:(g + 1) * 2 * H, :]      # (H, H) pair element two
            wbd = wbd.at[c * H:(c + 1) * H, g * H:(g + 1) * H].set(w_one.T)
            wbd = wbd.at[c * H:(c + 1) * H, half + g * H:half + (g + 1) * H].set(w_two.T)
            bias = bias.at[0, g * H:(g + 1) * H].set(conv_bias[g * 2 * H:g * 2 * H + H])
            bias = bias.at[0, half + g * H:half + (g + 1) * H].set(
                conv_bias[g * 2 * H + H:(g + 1) * 2 * H])
            g += 1
    # TODO(synk): for large H*P the dense (Kp, N_pad) weight wastes (n_cols-1)/n_cols of
    # the MXU FLOPs / resident VMEM; switch to a per-source-column loop or a group grid
    # axis with scalar-prefetched group->column indices in that regime.
    w_bf = wbd.astype(jnp.bfloat16)

    # --- generation-aware tiling of the flattened M = B*W row axis ---
    M = B * W
    out_bytes = out_dtype.itemsize
    # double-buffered x/out tiles + in-kernel f32 intermediates (y + rolled slab) + mask
    per_row = 2 * Kp * 2 + 2 * N_pad * out_bytes + 2 * N_pad * 4 + 2 * 4
    resident = 2 * (Kp * N_pad * 2 + N_pad * 4) + (1 << 20)
    vmem_budget = (48 << 20) if gen >= 7 else (64 << 20)       # v7x: 64 MiB physical VMEM
    target_rows = 1024 if gen >= 7 else 2048
    tile_m = _choose_tile_m(M, W, per_row, resident, vmem_budget, target_rows)
    num_tiles = -(-M // tile_m)
    if gen >= 7 and num_tiles > 1 and num_tiles % 2 == 1:
        num_tiles += 1            # even tile count: no 2-TensorCore tail imbalance on v7x
    m_pad = num_tiles * tile_m

    if m_pad != M or Kp != K:
        x = jnp.pad(x, ((0, m_pad - M), (0, Kp - K)))

    # w != 0 row mask; identical for every tile because tiles start at w == 0 rows.
    mask = (jnp.arange(tile_m) % W != 0).astype(jnp.float32).reshape(tile_m, 1)

    need = resident + per_row * tile_m + (2 << 20)
    vmem_limit = int(min(max(vmem_budget, need),
                         (56 << 20) if gen >= 7 else (112 << 20)))

    out = pl.pallas_call(
        functools.partial(_fused_conv1x1_shift_kernel, half=half),
        out_shape=jax.ShapeDtypeStruct((m_pad, N_pad), out_dtype),
        grid_spec=pltpu.PrefetchScalarGridSpec(
            num_scalar_prefetch=0,
            grid=(num_tiles,),
            in_specs=[
                pl.BlockSpec((tile_m, Kp), lambda i: (i, 0)),
                pl.BlockSpec((Kp, N_pad), lambda i: (0, 0)),   # constant -> DMA'd once, resident
                pl.BlockSpec((1, N_pad), lambda i: (0, 0)),
                pl.BlockSpec((tile_m, 1), lambda i: (0, 0)),
            ],
            out_specs=pl.BlockSpec((tile_m, N_pad), lambda i: (i, 0)),
        ),
        compiler_params=pltpu.CompilerParams(
            dimension_semantics=("parallel",),
            vmem_limit_bytes=vmem_limit),
    )(x, w_bf, bias, mask)

    # --- glue back to the module's list of (pair_one, shifted_pair_two) NCW pairs ---
    # one slice + one reshape + ONE transpose for the whole output.
    y = out[:M].reshape(B, W, 2, half)[:, :, :, :HP].reshape(B, W, 2, P, H)
    y = y.transpose(3, 2, 0, 4, 1)                             # (P, 2, B, H, W)
    # TODO(synk): for large W an NCW-native kernel variant (W on the lane axis, lane
    # roll for the shift) would remove this transpose and the NCW->NWC input pass.
    return [(y[gi, 0], y[gi, 1]) for gi in range(P)]


def reference_forward(previous_state_columns, conv_weight, conv_bias,
                      paired_weightings_per_group):
    """Pure-JAX reference mirroring the PyTorch semantics (grouped Conv1d, k=1)."""
    B, H, W = previous_state_columns[0].shape
    P = sum(paired_weightings_per_group)
    cat_list = []
    for idx, col in enumerate(previous_state_columns):
        cat_list.extend([col] * paired_weightings_per_group[idx])
    x = jnp.concatenate(cat_list, axis=1)                      # (B, H*P, W)
    w2d = conv_weight[:, :, 0]                                 # (2H*P, H)
    outs = []
    for g in range(P):
        xg = x[:, g * H:(g + 1) * H, :]                        # (B, H, W)
        wg = w2d[g * 2 * H:(g + 1) * 2 * H, :]                 # (2H, H)
        bg = conv_bias[g * 2 * H:(g + 1) * 2 * H]
        yg = jnp.einsum('oh,bhw->bow', wg, xg) + bg[None, :, None]
        outs.append(yg)
    y = jnp.concatenate(outs, axis=1)                          # (B, 2H*P, W)
    pairs = []
    for i in range(P):
        pe1 = y[:, (2 * i) * H:(2 * i + 1) * H, :]
        pe2 = y[:, (2 * i + 1) * H:(2 * i + 2) * H, :]
        pe2_shift = jnp.concatenate(
            [jnp.zeros_like(pe2[:, :, :1]), pe2[:, :, :-1]], axis=2)
        pairs.append((pe1, pe2_shift))
    return pairs


if __name__ == "__main__":
    key = jax.random.PRNGKey(0)
    B, H, W = 2, 32, 16
    paired_weightings_per_group = (2, 1)      # two previous states, P = 3 total pairs
    P = sum(paired_weightings_per_group)

    k1, k2, k3, k4 = jax.random.split(key, 4)
    col0 = jax.random.normal(k1, (B, H, W), jnp.float32)
    col1 = jax.random.normal(k2, (B, H, W), jnp.float32)
    # nn.Conv1d(H*P, 2*H*P, kernel_size=1, groups=P): weight (2H*P, H, 1), bias (2H*P,)
    conv_weight = 0.1 * jax.random.normal(k3, (2 * H * P, H, 1), jnp.float32)
    conv_bias = 0.1 * jax.random.normal(k4, (2 * H * P,), jnp.float32)

    pairs = parallel_multiple_state_weightings_forward(
        [col0, col1], conv_weight, conv_bias, paired_weightings_per_group,
        jnp.float32)
    jax.block_until_ready(pairs)

    # Tight check: reference computed with the same bf16 rounding of x / conv weight
    # (f32 accumulate), so the comparison validates the kernel wiring exactly.
    cols_bf = [c.astype(jnp.bfloat16).astype(jnp.float32) for c in (col0, col1)]
    w_bf = conv_weight.astype(jnp.bfloat16).astype(jnp.float32)
    ref_bf = reference_forward(cols_bf, w_bf, conv_bias, paired_weightings_per_group)
    # Loose check: pure-f32 PyTorch-equivalent reference (only diff is bf16 input rounding).
    ref_f32 = reference_forward([col0, col1], conv_weight, conv_bias,
                                paired_weightings_per_group)

    for (a1, a2), (r1, r2), (f1, f2) in zip(pairs, ref_bf, ref_f32):
        assert a1.shape == (B, H, W) and a2.shape == (B, H, W)
        assert jnp.allclose(a1, r1, atol=2e-3, rtol=2e-3)
        assert jnp.allclose(a2, r2, atol=2e-3, rtol=2e-3)
        assert jnp.allclose(a1, f1, atol=5e-2, rtol=5e-2)
        assert jnp.allclose(a2, f2, atol=5e-2, rtol=5e-2)

    print("KERNEL_OK")
</pallas_src>

<mosaic_0001>
module attributes {stable_mosaic.version = 11 : i64} {
  func.func @_fused_conv1x1_shift_kernel(%arg0: i32, %arg1: memref<16x64xbf16, #tpu.memory_space<vmem>>, %arg2: memref<64x256xbf16, #tpu.memory_space<vmem>>, %arg3: memref<1x256xf32, #tpu.memory_space<vmem>>, %arg4: memref<16x1xf32, #tpu.memory_space<vmem>>, %arg5: memref<16x256xf32, #tpu.memory_space<vmem>>) attributes {dimension_semantics = [#tpu.dimension_semantics<parallel>], iteration_bounds = array<i64: 2>, scalar_prefetch = 0 : i64, scratch_operands = 0 : i64, tpu.core_type = #tpu.core_type<tc>, window_params = [{transform_indices = @transform_0, window_bounds = array<i64: 16, 64>}, {pipeline_mode = #tpu.pipeline_mode<synchronous>, transform_indices = @transform_1, window_bounds = array<i64: 64, 256>}, {pipeline_mode = #tpu.pipeline_mode<synchronous>, transform_indices = @transform_2, window_bounds = array<i64: 1, 256>}, {pipeline_mode = #tpu.pipeline_mode<synchronous>, transform_indices = @transform_3, window_bounds = array<i64: 16, 1>}, {transform_indices = @transform_4, window_bounds = array<i64: 16, 256>}]} {
    %c0 = arith.constant 0 : index
    %c0_0 = arith.constant 0 : index
    %0 = vector.load %arg1[%c0, %c0_0] : memref<16x64xbf16, #tpu.memory_space<vmem>>, vector<16x64xbf16>
    %c0_1 = arith.constant 0 : index
    %c0_2 = arith.constant 0 : index
    %1 = vector.load %arg2[%c0_1, %c0_2] : memref<64x256xbf16, #tpu.memory_space<vmem>>, vector<64x256xbf16>
    %cst = arith.constant dense<0.000000e+00> : vector<16x256xf32>
    %2 = tpu.matmul %0, %1, %cst {dimension_numbers = #tpu.dot_dimension_numbers<[1], [0], [0], [1], [0, 0, 1, 1], [], []>} : vector<16x64xbf16>, vector<64x256xbf16>, vector<16x256xf32> -> vector<16x256xf32>
    %c0_3 = arith.constant 0 : index
    %c0_4 = arith.constant 0 : index
    %3 = vector.load %arg3[%c0_3, %c0_4] : memref<1x256xf32, #tpu.memory_space<vmem>>, vector<1x256xf32>
    %4 = vector.broadcast %3 : vector<1x256xf32> to vector<16x256xf32>
    %5 = arith.addf %2, %4 : vector<16x256xf32>
    %6 = vector.extract_strided_slice %5 {offsets = [0, 0], sizes = [16, 128], strides = [1, 1]} : vector<16x256xf32> to vector<16x128xf32>
    %c0_5 = arith.constant 0 : index
    %c0_6 = arith.constant 0 : index
    %7 = vector.load %arg5[%c0_5, %c0_6] : memref<16x256xf32, #tpu.memory_space<vmem>>, vector<16x128xf32>
    tpu.vector_store %arg5[%c0_5, %c0_6], %6 {strides = array<i32>} : memref<16x256xf32, #tpu.memory_space<vmem>>, vector<16x128xf32>,
    %8 = vector.extract_strided_slice %5 {offsets = [0, 128], sizes = [16, 128], strides = [1, 1]} : vector<16x256xf32> to vector<16x128xf32>
    %c1_i32 = arith.constant 1 : i32
    %9 = tpu.dynamic_rotate %8 by %c1_i32 dim 0 : vector<16x128xf32>, i32 -> vector<16x128xf32>
    %c0_7 = arith.constant 0 : index
    %c0_8 = arith.constant 0 : index
    %10 = vector.load %arg4[%c0_7, %c0_8] : memref<16x1xf32, #tpu.memory_space<vmem>>, vector<16x1xf32>
    %11 = vector.broadcast %10 : vector<16x1xf32> to vector<16x128xf32>
    %12 = arith.mulf %9, %11 : vector<16x128xf32>
    %c0_9 = arith.constant 0 : index
    %c128 = arith.constant 128 : index
    %13 = vector.load %arg5[%c0_9, %c128] : memref<16x256xf32, #tpu.memory_space<vmem>>, vector<16x128xf32>
    tpu.vector_store %arg5[%c0_9, %c128], %12 {strides = array<i32>} : memref<16x256xf32, #tpu.memory_space<vmem>>, vector<16x128xf32>,
    return
  }
  func.func @transform_0(%arg0: i32) -> (i32, i32) {
    %c0_i32 = arith.constant 0 : i32
    %c0_i32_0 = arith.constant 0 : i32
    return %arg0, %c0_i32 : i32, i32
  }
  func.func @transform_1(%arg0: i32) -> (i32, i32) {
    %c0_i32 = arith.constant 0 : i32
    %c0_i32_0 = arith.constant 0 : i32
    %c0_i32_1 = arith.constant 0 : i32
    return %c0_i32, %c0_i32_0 : i32, i32
  }
  func.func @transform_2(%arg0: i32) -> (i32, i32) {
    %c0_i32 = arith.constant 0 : i32
    %c0_i32_0 = arith.constant 0 : i32
    %c0_i32_1 = arith.constant 0 : i32
    return %c0_i32, %c0_i32_0 : i32, i32
  }
  func.func @transform_3(%arg0: i32) -> (i32, i32) {
    %c0_i32 = arith.constant 0 : i32
    %c0_i32_0 = arith.constant 0 : i32
    %c0_i32_1 = arith.constant 0 : i32
    return %c0_i32, %c0_i32_0 : i32, i32
  }
  func.func @transform_4(%arg0: i32) -> (i32, i32) {
    %c0_i32 = arith.constant 0 : i32
    %c0_i32_0 = arith.constant 0 : i32
    return %arg0, %c0_i32 : i32, i32
  }
}

</mosaic_0001>

<bundles_post_ra>
// kernel: parallel_multiple_state_weightings_forward.1
= control target key start
LH: loop header
LB: loop body
LE: loop exit
PB: predicated region body
PF: predicated region fallthrough
CT: control target
= control target key end

     0   :  { %s481_s15 = smov 0   ;;  %s531_s0 = inlined_call_operand.vmem [shape: bf16[32,64], index: 0, kind: input, shape index: {}]   ;;  %s532_s1 = inlined_call_operand.vmem [shape: bf16[64,256], index: 1, kind: input, shape index: {}]   ;;  %s533_s2 = inlined_call_operand.vmem [shape: f32[1,256], index: 2, kind: input, shape index: {}]   ;;  %s534_s3 = inlined_call_operand.vmem [shape: f32[16,1], index: 3, kind: input, shape index: {}]   ;;  %s535_s4 = inlined_call_operand.vmem [shape: f32[32,256], index: 4, kind: output, shape index: {}]  }
   0x1 LB: > { %s401_s16 = sadd.s32 4294967295, %s453_s15   ;;  %p405_p0 = scmp.ge.s32.totalorder %s453_s15, 1  ;;  %s453_s15 = sphi %s481_s15, %s14_s15  }
   0x2   : > { %p163_p1 = scmp.lt.s32.totalorder %s453_s15, 3 }
   0x4   : > { %p164_p2 = pnand %p405_p0, %p163_p1 }
   0x5   : > { %s406_s19 = sshll.u32 (!%p164_p2), %s401_s16, 1 }
   0x6   : > { %167 = sbr.rel (%p164_p2) target bundleno = 236 (0xec), region = 36  ;;  %p191_p3 = scmp.lt.s32.totalorder (!%p164_p2), %s406_s19, 3 }
   0xb   : > { %v434_v0 = vld [vmem:[%s532_s1 + $0x34] ss:$8 sps:$4 sm:$0xff]   ;;  %v436_v1 = vld [vmem:[%s532_s1 + $0x30] ss:$8 sps:$4 sm:$0xff]   ;;  %v455_v2 = vmov 0   ;;  %s537_s19 = smov (!%p191_p3, %s406_s19), 3  ;;  %v216_v12 = vlaneseq }
   0xc   : > { %307 = vmatprep.mubr.bf16.mxu0 %v455_v2  ;;  %433 = vset.pattern.permute.xlu0 %v455_v2  ;;  %v437_v3 = vld [vmem:[%s532_s1 + $0x24] ss:$8 sps:$4 sm:$0xff]   ;;  %v439_v4 = vld [vmem:[%s532_s1 + $0x20] ss:$8 sps:$4 sm:$0xff]   ;;  %v440_v5 = vld [vmem:[%s532_s1 + $0x14] ss:$8 sps:$4 sm:$0xff]  }
   0xd   : > { %283 = vmatprep.subr.bf16.mxu0 %v434_v0  ;;  %s407_s28 = sshll.u32 %s537_s19, 2  ;;  %v327_v6 = vld [vmem:[%s534_s3] sm:$0xff]  ;;  %v442_v7 = vld [vmem:[%s532_s1 + $0x10] ss:$8 sps:$4 sm:$0xff]   ;;  %v328_v8 = vld [vmem:[%s534_s3 + $0x8] sm:$0xff]  ;;  %vm271_vm0 = vcmask 523264  }
   0xe   : > { %284 = vmatpush1.bf16.msra.mxu0 %v436_v1  ;;  %s194_s9 = scalar_lea.vmem %s531_s0, %s407_s28  ;;  %331 = vperm.xlu0 %433, %v327_v6   ;;  %v443_v9 = vld [vmem:[%s532_s1 + $0x4] ss:$8 sps:$4 sm:$0xff]   ;;  %v445_v10 = vld [vmem:[%s532_s1] ss:$8 sps:$4 sm:$0xff]   ;;  %v217_v13 = vshrl.u32 %v216_v12, 7  ;;  %s423_s20 = sshll.u32 %s537_s19, 4 }
   0xf   : > { %285 = vmatprep.subr.bf16.mxu0 %v437_v3  ;;  %v446_v11 = vld [vmem:[%s194_s9] sm:$0xff]   ;;  %s201_s23 = scalar_lea.vmem %s535_s4, %s423_s20 }
  0x10   : > { %v218_v14 = vsub.s32 0, %v217_v13  ;;  %v214_v15 = vld [vmem:[%s533_s2] sm:$0x3]  ;;  %v222_v17 = vsub.s32 1, %v217_v13  ;;  %vm324_vm1 = vcmp.lt.s32.totalorder %v217_v13, 1 }
  0x12   : > { %286 = vmatpush1.bf16.msra.mxu0 %v439_v4  ;;  %336 = vperm.xlu0 %433, %v328_v8   ;;  %v219_v16 = vrot.slane %v214_v15, %v218_v14  ;;  %v223_v20 = vrot.slane %v214_v15, %v222_v17 }
  0x13   : > { %287 = vmatprep.subr.bf16.mxu0 %v440_v5 }
  0x16   : > { %288 = vmatpush1.bf16.msra.mxu0 %v442_v7 }
  0x17   : > { %289 = vmatprep.subr.bf16.mxu0 %v443_v9 }
  0x1a   : > { %290 = vmatpush1.bf16.msra.mxu0 %v445_v10 }
  0x1d   : > { %420 = vmatmul.mubr.msk.bf16.vlgmr.msra.gmra.mxu0 %vm271_vm0, %v446_v11 }
  0x89   : > { %v332_v24 = vpop.permute.xlu0 %331 }
  0x8d   : > { %v337_v30 = vpop.permute.xlu0 %336 }
  0xdd   : > { %v309_v18 = vpop.f32.mrf.mxu0 }
  0xde   : > { %v310_v19 = vadd.f32 %v309_v18, %v219_v16 }
  0xdf   : > { %v311_v21 = vpop.f32.mrf.mxu0 }
  0xe0   : > { %318 = vst [vmem:[%s201_s23] sm:$0xff] %v310_v19  ;;  %v312_v23 = vadd.f32 %v311_v21, %v223_v20 }
  0xe1   : > { %v313_v22 = vpop.f32.mrf.mxu0 }
  0xe2   : > { %v314_v25 = vadd.f32 %v313_v22, %v219_v16  ;;  %v320_v28 = vrot.slane %v312_v23, 7 }
  0xe3   : > { %v315_v26 = vpop.f32.mrf.mxu0 }
  0xe4   : > { %319 = vst [vmem:[%s201_s23 + $0x10] sm:$0xff] %v314_v25  ;;  %v316_v27 = vadd.f32 %v315_v26, %v223_v20 }
  0xe6   : > { %v321_v29 = vrot.slane %v316_v27, 7 }
  0xe8   : > { %v325_v31 = vsel %vm324_vm1, %v320_v28, %v321_v29  ;;  %v326_v32 = vsel %vm324_vm1, %v321_v29, %v320_v28 }
  0xe9   : > { %v339_v33 = vmul.f32 %v332_v24, %v326_v32  ;;  %v340_v34 = vmul.f32 %v337_v30, %v325_v31 }
  0xeb   : > { %341 = vst [vmem:[%s201_s23 + $0x8] sm:$0xff] %v339_v33  ;;  %342 = vst [vmem:[%s201_s23 + $0x18] sm:$0xff] %v340_v34 }
  0xec PF: > { %s14_s15 = sadd.s32 1, %s453_s15  }
  0xed   : > { %p11_p4 = scmp.ge.s32.totalorder %s14_s15, 4  }
  0xef   :  { %13 = sbr.rel (!%p11_p4) target bundleno = 1 (0x1), region = 66 }

</bundles_post_ra>
